<compile_context>
chip_gen: v5e
topology: v5e:2x2
jax: 0.10.0
libtpu: 0.0.40
codegen_flags: <defaults>
</compile_context>

<pallas_src>
from functools import partial

import jax
import jax.numpy as jnp
from jax.experimental import pallas as pl
from jax.experimental.pallas import tpu as pltpu


def mlp_kernel(x_ref, w1_ref, b1_ref, w2_ref, b2_ref, w3_ref, b3_ref, o_ref):
    # Layer 1: bf16 MXU matmul, f32 accumulation; bias + ReLU on f32 accumulator (VPU).
    h1 = jnp.dot(x_ref[...], w1_ref[...], preferred_element_type=jnp.float32)
    h1 = jnp.maximum(h1 + b1_ref[...], 0.0)
    # Layer 2: Linear + ReLU
    h2 = jnp.dot(h1.astype(jnp.bfloat16), w2_ref[...],
                 preferred_element_type=jnp.float32)
    h2 = jnp.maximum(h2 + b2_ref[...], 0.0)
    # Layer 3: Linear (no activation)
    out = jnp.dot(h2.astype(jnp.bfloat16), w3_ref[...],
                  preferred_element_type=jnp.float32)
    o_ref[...] = (out + b3_ref[...]).astype(o_ref.dtype)


def _round_up(n, m):
    return ((n + m - 1) // m) * m


def prepare_mlp_params(params):
    """One-time parameter prep (call at init / load time, NOT per forward):
    pad the hidden dim to a multiple of 128 with zeros (exact math: padded hidden
    cols get zero weight + zero bias -> ReLU(0)=0, and the matching zero rows of
    the next weight contribute nothing) and cast weights to bf16. Biases stay f32
    so bias+ReLU run on the f32 accumulator. Input/output dims are NOT padded."""
    w1, b1, w2, b2, w3, b3 = (params["w1"], params["b1"], params["w2"],
                              params["b2"], params["w3"], params["b3"])
    hid = w1.shape[1]
    hid_p = _round_up(hid, 128)

    def pad2(a, rows, cols):
        return jnp.pad(a, ((0, rows - a.shape[0]), (0, cols - a.shape[1])))

    return {
        "w1": pad2(w1, w1.shape[0], hid_p).astype(jnp.bfloat16),
        "b1": pad2(b1, 1, hid_p).astype(jnp.float32),
        "w2": pad2(w2, hid_p, hid_p).astype(jnp.bfloat16),
        "b2": pad2(b2, 1, hid_p).astype(jnp.float32),
        "w3": pad2(w3, hid_p, w3.shape[1]).astype(jnp.bfloat16),
        "b3": b3.astype(jnp.float32),
    }


@partial(jax.jit, static_argnames=("tm",))
def mlp_forward(x, prep, *, tm=512):
    """x: (B, input_dim). prep: output of prepare_mlp_params (bf16 weights, hidden
    padded to 128). Returns (B, output_dim) float32."""
    w1, b1, w2, b2, w3, b3 = (prep["w1"], prep["b1"], prep["w2"],
                              prep["b2"], prep["w3"], prep["b3"])
    B, d_in = x.shape
    d_out = w3.shape[1]

    # Batch tile: 512-row tiles for large batches; for small batches aim for >= 2
    # roughly-equal grid steps so both v7x TensorCores get work (no-op on v5e/v6e).
    if B > tm:
        tm_eff = tm
    else:
        tm_eff = max(8, _round_up((B + 1) // 2, 8))
    grid = (pl.cdiv(B, tm_eff),)

    xb = x.astype(jnp.bfloat16)  # halves the dominant x HBM stream inside the kernel

    # Weights/biases: constant block index -> DMA'd once, VMEM-resident across steps.
    const = lambda a: pl.BlockSpec(a.shape, lambda i: (0, 0))

    out = pl.pallas_call(
        mlp_kernel,
        out_shape=jax.ShapeDtypeStruct((B, d_out), jnp.float32),
        grid=grid,
        in_specs=[
            # x tile per step; lane dim == full d_in (no HBM lane padding).
            pl.BlockSpec((tm_eff, d_in), lambda i: (i, 0)),
            const(w1), const(b1),
            const(w2), const(b2),
            const(w3), const(b3),
        ],
        # Output written unpadded; lane dim == full d_out, partial last block masked.
        out_specs=pl.BlockSpec((tm_eff, d_out), lambda i: (i, 0)),
        compiler_params=pltpu.CompilerParams(
            dimension_semantics=("parallel",),  # 2-TC sharding on v7x; no-op v5e/v6e
        ),
    )(xb, w1, b1, w2, b2, w3, b3)

    return out


def init_mlp_params(key, input_dim, output_dim, hidden_size, dtype=jnp.float32):
    """Deterministic init mimicking nn.Linear default (U[-1/sqrt(fan_in), 1/sqrt(fan_in)]).

    Weights stored as (in_features, out_features) == torch weight.T, so the kernel
    computes x @ W + b with identical semantics to torch's x @ weight.T + bias.
    """
    ks = jax.random.split(key, 6)

    def layer(kw, kb, fan_in, fan_out):
        bound = 1.0 / jnp.sqrt(jnp.asarray(fan_in, dtype))
        w = jax.random.uniform(kw, (fan_in, fan_out), dtype, -bound, bound)
        b = jax.random.uniform(kb, (1, fan_out), dtype, -bound, bound)
        return w, b

    w1, b1 = layer(ks[0], ks[1], input_dim, hidden_size)
    w2, b2 = layer(ks[2], ks[3], hidden_size, hidden_size)
    w3, b3 = layer(ks[4], ks[5], hidden_size, output_dim)
    return {"w1": w1, "b1": b1, "w2": w2, "b2": b2, "w3": w3, "b3": b3}


def mlp_reference(x, params):
    h1 = jnp.maximum(x @ params["w1"] + params["b1"], 0.0)
    h2 = jnp.maximum(h1 @ params["w2"] + params["b2"], 0.0)
    return h2 @ params["w3"] + params["b3"]


if __name__ == "__main__":
    key = jax.random.PRNGKey(0)
    k_x, k_p, k_xb, k_xc = jax.random.split(key, 4)

    batch, input_dim, output_dim, hidden_size = 4, 16, 8, 32
    params = init_mlp_params(k_p, input_dim, output_dim, hidden_size)
    prep = jax.tree_util.tree_map(jax.block_until_ready, prepare_mlp_params(params))

    # bf16 operands / f32 accumulation -> compare to f32 reference with bf16 tolerance.
    TOL = dict(atol=5e-2, rtol=5e-2)

    # Small-shape check (single padded grid step).
    x = jax.random.normal(k_x, (batch, input_dim), jnp.float32)
    out = jax.block_until_ready(mlp_forward(x, prep))
    ref = mlp_reference(x, params)
    assert out.shape == (batch, output_dim)
    assert jnp.allclose(out, ref, **TOL)

    # Medium batch: 2 balanced steps (tm_eff=256), partial last block (244 rows).
    xb = jax.random.normal(k_xb, (500, input_dim), jnp.float32)
    outb = jax.block_until_ready(mlp_forward(xb, prep))
    refb = mlp_reference(xb, params)
    assert outb.shape == (500, output_dim)
    assert jnp.allclose(outb, refb, **TOL)

    # Large batch: B > TM path (tm_eff=512, grid=3, partial last block).
    xc = jax.random.normal(k_xc, (1500, input_dim), jnp.float32)
    outc = jax.block_until_ready(mlp_forward(xc, prep))
    refc = mlp_reference(xc, params)
    assert outc.shape == (1500, output_dim)
    assert jnp.allclose(outc, refc, **TOL)

    print("KERNEL_OK")
</pallas_src>

<mosaic_0001>
module attributes {stable_mosaic.version = 11 : i64} {
  func.func @mlp_kernel(%arg0: i32, %arg1: memref<8x16xbf16, #tpu.memory_space<vmem>>, %arg2: memref<16x128xbf16, #tpu.memory_space<vmem>>, %arg3: memref<1x128xf32, #tpu.memory_space<vmem>>, %arg4: memref<128x128xbf16, #tpu.memory_space<vmem>>, %arg5: memref<1x128xf32, #tpu.memory_space<vmem>>, %arg6: memref<128x8xbf16, #tpu.memory_space<vmem>>, %arg7: memref<1x8xf32, #tpu.memory_space<vmem>>, %arg8: memref<8x8xf32, #tpu.memory_space<vmem>>) attributes {dimension_semantics = [#tpu.dimension_semantics<parallel>], iteration_bounds = array<i64: 1>, scalar_prefetch = 0 : i64, scratch_operands = 0 : i64, tpu.core_type = #tpu.core_type<tc>, window_params = [{transform_indices = @transform_0, window_bounds = array<i64: 8, 16>}, {pipeline_mode = #tpu.pipeline_mode<synchronous>, transform_indices = @transform_1, window_bounds = array<i64: 16, 128>}, {pipeline_mode = #tpu.pipeline_mode<synchronous>, transform_indices = @transform_2, window_bounds = array<i64: 1, 128>}, {pipeline_mode = #tpu.pipeline_mode<synchronous>, transform_indices = @transform_3, window_bounds = array<i64: 128, 128>}, {pipeline_mode = #tpu.pipeline_mode<synchronous>, transform_indices = @transform_4, window_bounds = array<i64: 1, 128>}, {pipeline_mode = #tpu.pipeline_mode<synchronous>, transform_indices = @transform_5, window_bounds = array<i64: 128, 8>}, {pipeline_mode = #tpu.pipeline_mode<synchronous>, transform_indices = @transform_6, window_bounds = array<i64: 1, 8>}, {transform_indices = @transform_7, window_bounds = array<i64: 8, 8>}]} {
    %c0 = arith.constant 0 : index
    %c0_0 = arith.constant 0 : index
    %0 = vector.load %arg1[%c0, %c0_0] : memref<8x16xbf16, #tpu.memory_space<vmem>>, vector<8x16xbf16>
    %c0_1 = arith.constant 0 : index
    %c0_2 = arith.constant 0 : index
    %1 = vector.load %arg2[%c0_1, %c0_2] : memref<16x128xbf16, #tpu.memory_space<vmem>>, vector<16x128xbf16>
    %cst = arith.constant dense<0.000000e+00> : vector<8x128xf32>
    %2 = tpu.matmul %0, %1, %cst {dimension_numbers = #tpu.dot_dimension_numbers<[1], [0], [0], [1], [0, 0, 1, 1], [], []>} : vector<8x16xbf16>, vector<16x128xbf16>, vector<8x128xf32> -> vector<8x128xf32>
    %c0_3 = arith.constant 0 : index
    %c0_4 = arith.constant 0 : index
    %3 = vector.load %arg3[%c0_3, %c0_4] : memref<1x128xf32, #tpu.memory_space<vmem>>, vector<1x128xf32>
    %4 = vector.broadcast %3 : vector<1x128xf32> to vector<8x128xf32>
    %5 = arith.addf %2, %4 : vector<8x128xf32>
    %cst_5 = arith.constant 0.000000e+00 : f32
    %6 = vector.broadcast %cst_5 : f32 to vector<8x128xf32>
    %7 = arith.maximumf %5, %6 : vector<8x128xf32>
    %8 = arith.truncf %7 : vector<8x128xf32> to vector<8x128xbf16>
    %c0_6 = arith.constant 0 : index
    %c0_7 = arith.constant 0 : index
    %9 = vector.load %arg4[%c0_6, %c0_7] : memref<128x128xbf16, #tpu.memory_space<vmem>>, vector<128x128xbf16>
    %cst_8 = arith.constant dense<0.000000e+00> : vector<8x128xf32>
    %10 = tpu.matmul %8, %9, %cst_8 {dimension_numbers = #tpu.dot_dimension_numbers<[1], [0], [0], [1], [0, 0, 1, 1], [], []>} : vector<8x128xbf16>, vector<128x128xbf16>, vector<8x128xf32> -> vector<8x128xf32>
    %c0_9 = arith.constant 0 : index
    %c0_10 = arith.constant 0 : index
    %11 = vector.load %arg5[%c0_9, %c0_10] : memref<1x128xf32, #tpu.memory_space<vmem>>, vector<1x128xf32>
    %12 = vector.broadcast %11 : vector<1x128xf32> to vector<8x128xf32>
    %13 = arith.addf %10, %12 : vector<8x128xf32>
    %cst_11 = arith.constant 0.000000e+00 : f32
    %14 = vector.broadcast %cst_11 : f32 to vector<8x128xf32>
    %15 = arith.maximumf %13, %14 : vector<8x128xf32>
    %16 = arith.truncf %15 : vector<8x128xf32> to vector<8x128xbf16>
    %c0_12 = arith.constant 0 : index
    %c0_13 = arith.constant 0 : index
    %17 = vector.load %arg6[%c0_12, %c0_13] : memref<128x8xbf16, #tpu.memory_space<vmem>>, vector<128x8xbf16>
    %cst_14 = arith.constant dense<0.000000e+00> : vector<8x8xf32>
    %18 = tpu.matmul %16, %17, %cst_14 {dimension_numbers = #tpu.dot_dimension_numbers<[1], [0], [0], [1], [0, 0, 1, 1], [], []>} : vector<8x128xbf16>, vector<128x8xbf16>, vector<8x8xf32> -> vector<8x8xf32>
    %c0_15 = arith.constant 0 : index
    %c0_16 = arith.constant 0 : index
    %19 = vector.load %arg7[%c0_15, %c0_16] : memref<1x8xf32, #tpu.memory_space<vmem>>, vector<1x8xf32>
    %20 = vector.broadcast %19 : vector<1x8xf32> to vector<8x8xf32>
    %21 = arith.addf %18, %20 : vector<8x8xf32>
    %c0_17 = arith.constant 0 : index
    %c0_18 = arith.constant 0 : index
    %22 = vector.load %arg8[%c0_17, %c0_18] : memref<8x8xf32, #tpu.memory_space<vmem>>, vector<8x8xf32>
    tpu.vector_store %arg8[%c0_17, %c0_18], %21 {strides = array<i32>} : memref<8x8xf32, #tpu.memory_space<vmem>>, vector<8x8xf32>,
    return
  }
  func.func @transform_0(%arg0: i32) -> (i32, i32) {
    %c0_i32 = arith.constant 0 : i32
    %c0_i32_0 = arith.constant 0 : i32
    return %arg0, %c0_i32 : i32, i32
  }
  func.func @transform_1(%arg0: i32) -> (i32, i32) {
    %c0_i32 = arith.constant 0 : i32
    %c0_i32_0 = arith.constant 0 : i32
    %c0_i32_1 = arith.constant 0 : i32
    return %c0_i32, %c0_i32_0 : i32, i32
  }
  func.func @transform_2(%arg0: i32) -> (i32, i32) {
    %c0_i32 = arith.constant 0 : i32
    %c0_i32_0 = arith.constant 0 : i32
    %c0_i32_1 = arith.constant 0 : i32
    return %c0_i32, %c0_i32_0 : i32, i32
  }
  func.func @transform_3(%arg0: i32) -> (i32, i32) {
    %c0_i32 = arith.constant 0 : i32
    %c0_i32_0 = arith.constant 0 : i32
    %c0_i32_1 = arith.constant 0 : i32
    return %c0_i32, %c0_i32_0 : i32, i32
  }
  func.func @transform_4(%arg0: i32) -> (i32, i32) {
    %c0_i32 = arith.constant 0 : i32
    %c0_i32_0 = arith.constant 0 : i32
    %c0_i32_1 = arith.constant 0 : i32
    return %c0_i32, %c0_i32_0 : i32, i32
  }
  func.func @transform_5(%arg0: i32) -> (i32, i32) {
    %c0_i32 = arith.constant 0 : i32
    %c0_i32_0 = arith.constant 0 : i32
    %c0_i32_1 = arith.constant 0 : i32
    return %c0_i32, %c0_i32_0 : i32, i32
  }
  func.func @transform_6(%arg0: i32) -> (i32, i32) {
    %c0_i32 = arith.constant 0 : i32
    %c0_i32_0 = arith.constant 0 : i32
    %c0_i32_1 = arith.constant 0 : i32
    return %c0_i32, %c0_i32_0 : i32, i32
  }
  func.func @transform_7(%arg0: i32) -> (i32, i32) {
    %c0_i32 = arith.constant 0 : i32
    %c0_i32_0 = arith.constant 0 : i32
    return %arg0, %c0_i32 : i32, i32
  }
}

</mosaic_0001>

<bundles_post_ra>
// kernel: mlp_forward.1
= control target key start
LH: loop header
LB: loop body
LE: loop exit
PB: predicated region body
PF: predicated region fallthrough
CT: control target
= control target key end

     0   :  { %12 = vsyncpa [#allocation3], 0  ;;  %s531_s0 = inlined_call_operand.vmem [shape: bf16[4,16], index: 0, kind: input, shape index: {}]   ;;  %s532_s1 = inlined_call_operand.hbm [shape: bf16[16,128], index: 1, kind: input, shape index: {}]   ;;  %s533_s2 = inlined_call_operand.vmem [shape: f32[1,128], index: 2, kind: input, shape index: {}]   ;;  %s534_s3 = inlined_call_operand.vmem [shape: bf16[128,128], index: 3, kind: input, shape index: {}]   ;;  %s535_s4 = inlined_call_operand.vmem [shape: f32[1,128], index: 4, kind: input, shape index: {}]   ;;  %s536_s5 = inlined_call_operand.vmem [shape: bf16[128,8], index: 5, kind: input, shape index: {}]   ;;  %s537_s6 = inlined_call_operand.vmem [shape: f32[1,8], index: 6, kind: input, shape index: {}]   ;;  %s538_s7 = inlined_call_operand.hbm [shape: f32[4,8], index: 7, kind: output, shape index: {}]  }
   0x1   :  { %13 = vsyncpa [#allocation4], 0  ;;  %s20_s26 = sshll.u32 %s532_s1, 4  ;;  %s412_s27 = smov [#allocation2]   ;;  %s21_s26 = int_to_ptr.hbm [resolvable:$true] %s20_s26 }
   0x2   :  { %s22_s28 = sshll.u32 %s412_s27, 4  ;;  %s413_s29 = smov 64   ;;  %s23_s28 = int_to_ptr.vmem [resolvable:$true] %s22_s28 }
   0x3   :  { %s414_s30 = smov 4  }
   0x4   :  { %28 = dma.hbm_to_vmem [thread:$0]  %s21_s26, 128, %s23_s28, [#allocation3], %s413_s29, %s413_s29, %s414_s30  }
   0x5   :  { %408 = dma.done.wait [#allocation3], 128  }
   0x6   :  { %409 = vsyncadd [#allocation3], 4294967168  ;;  %v336_v0 = vld [vmem:[#allocation2] sm:$0xff]  ;;  %v44_v1 = vld [vmem:[%s531_s0] sm:$0x3]  ;;  %vm64_vm0 = vcmask 130048  }
   0x7   :  { %v45_v2 = vld [vmem:[%s531_s0 + $0x2] sm:$0x3]  ;;  %53 = vst [vmem:[#allocation1] ss:$4 sm:$0xff] %v44_v1  ;;  %v344_v3 = vld [vmem:[%s534_s3 + $0x38] sm:$0xff]  ;;  %74 = vmatpush.bf16.msra.mxu0 %v336_v0  ;;  %v343_v4 = vld [vmem:[%s534_s3 + $0x30] sm:$0xff] }
   0x8   :  { %56 = vst [vmem:[#allocation1 + $0x1] ss:$4 sm:$0xff] %v45_v2  ;;  %150 = vmatpush.bf16.msra.mxu1 %v344_v3  ;;  %v342_v5 = vld [vmem:[%s534_s3 + $0x28] sm:$0xff]  ;;  %v341_v7 = vld [vmem:[%s534_s3 + $0x20] sm:$0xff]  ;;  %v340_v8 = vld [vmem:[%s534_s3 + $0x18] sm:$0xff]  ;;  %vm246_vm1 = vcmask 64512  }
   0x9   :  { %v339_v9 = vld [vmem:[%s534_s3 + $0x10] sm:$0xff]  ;;  %v338_v10 = vld [vmem:[%s534_s3 + $0x8] sm:$0xff]  ;;  %v337_v11 = vld [vmem:[%s534_s3] sm:$0xff] }
   0xa   :  { %v352_v12 = vld [vmem:[%s536_s5 + $0x38] sm:$0xff]  ;;  %v351_v13 = vld [vmem:[%s536_s5 + $0x30] sm:$0xff]  ;;  %v350_v14 = vld [vmem:[%s536_s5 + $0x28] sm:$0xff] }
   0xb   :  { %233 = vmatpush.bf16.msra.mxu2 %v352_v12  ;;  %v349_v15 = vld [vmem:[%s536_s5 + $0x20] sm:$0xff]  ;;  %v348_v16 = vld [vmem:[%s536_s5 + $0x18] sm:$0xff]  ;;  %v347_v17 = vld [vmem:[%s536_s5 + $0x10] sm:$0xff] }
   0xc   :  { %151 = vmatpush.bf16.msra.mxu1 %v343_v4  ;;  %v357_v18 = vld [vmem:[%s533_s2] ss:$0 sm:$0xff]  ;;  %v346_v24 = vld [vmem:[%s536_s5 + $0x8] sm:$0xff] }
   0xd   :  { %v345_v25 = vld [vmem:[%s536_s5] sm:$0xff] }
   0xe   :  { %v358_v26 = vld [vmem:[%s535_s4] ss:$0 sm:$0xff] }
   0xf   :  { %v57_v6 = vld.sshfl [vmem:[#allocation1] sm:$0xff pattern:$0x73625140]  ;;  %234 = vmatpush.bf16.msra.mxu2 %v351_v13 }
  0x10   :  { %271 = vmatmul.msk.bf16.vlgmr.msra.gmra.mxu0 %vm64_vm0, %v57_v6  ;;  %152 = vmatpush.bf16.msra.mxu1 %v342_v5  ;;  %v359_v32 = vld [vmem:[%s537_s6] ss:$0 sm:$0xff] }
  0x13   :  { %235 = vmatpush.bf16.msra.mxu2 %v350_v14 }
  0x14   :  { %153 = vmatpush.bf16.msra.mxu1 %v341_v7 }
  0x17   :  { %236 = vmatpush.bf16.msra.mxu2 %v349_v15 }
  0x18   :  { %154 = vmatpush.bf16.msra.mxu1 %v340_v8 }
  0x1b   :  { %237 = vmatpush.bf16.msra.mxu2 %v348_v16 }
  0x1c   :  { %155 = vmatpush.bf16.msra.mxu1 %v339_v9 }
  0x1f   :  { %238 = vmatpush.bf16.msra.mxu2 %v347_v17 }
  0x20   :  { %156 = vmatpush.bf16.msra.mxu1 %v338_v10 }
  0x23   :  { %239 = vmatpush.bf16.msra.mxu2 %v346_v24 }
  0x24   :  { %157 = vmatpush.bf16.msra.mxu1 %v337_v11 }
  0x27   :  { %240 = vmatpush.bf16.msra.mxu2 %v345_v25 }
  0x8d   :  { %v76_v19 = vpop.f32.mrf.mxu0 }
  0x8e   :  { %v77_v20 = vadd.f32 %v357_v18, %v76_v19 }
  0x90   :  { %v80_v21 = vmax.f32 %v77_v20, 0.0 }
  0x92   :  { %v81_v22 = vpack.c.bf16 %v80_v21, %v80_v21 }
  0x94   :  { %158 = vmatmul.bf16.vlgmr.msra.gmra.mxu1 %v81_v22 }
  0x95   :  { %v78_v23 = vpop.f32.mrf.mxu0 }
 0x111   :  { %v159_v27 = vpop.f32.mrf.mxu1 }
 0x112   :  { %v160_v28 = vadd.f32 %v358_v26, %v159_v27 }
 0x114   :  { %v163_v29 = vmax.f32 %v160_v28, 0.0 }
 0x116   :  { %v164_v30 = vpack.c.bf16 %v163_v29, %v163_v29 }
 0x118   :  { %241 = vmatmul.bf16.vlgmr.msra.gmra.mxu2 %v164_v30 }
 0x119   :  { %v161_v31 = vpop.f32.mrf.mxu1 }
 0x19b   :  { %v242_v33 = vpop.f32.mrf.mxu2 }
 0x19c   :  { %v243_v34 = vadd.f32 %v359_v32, %v242_v33 }
 0x19e   :  { %247 = vst.msk [vmem:[#allocation5] sm:$0xff] %vm246_vm1, %v243_v34 }
 0x1a3   :  { %v244_v35 = vpop.f32.mrf.mxu2 }
 0x1a4   :  { %251 = vsyncadd [#allocation4], 64  ;;  %s254_s4 = sshll.u32 %s538_s7, 4  ;;  %s415_s24 = smov [#allocation5]   ;;  %s255_s4 = int_to_ptr.hbm [resolvable:$true] %s254_s4 }
 0x1a5   :  { %s252_s25 = sshll.u32 %s415_s24, 4  ;;  %s253_s25 = int_to_ptr.vmem [resolvable:$true] %s252_s25 }
 0x1a6   :  { %260 = dma.vmem_to_hbm [thread:$0]  %s253_s25, 64, %s255_s4, [#allocation4], %s413_s29, %s413_s29, %s414_s30  }
 0x1a7   :  { %410 = dma.done.wait [#allocation4], 128  }
 0x1a8   :  { %411 = vsyncadd [#allocation4], 4294967168 }
 0x1a9   :  { %265 = vsyncpa [#allocation3], 1 }
 0x1aa   :  { %266 = vsyncpa [#allocation4], 1 }

</bundles_post_ra>
